<compile_context>
chip_gen: v5e
topology: v5e:2x2
jax: 0.10.0
libtpu: 0.0.40
codegen_flags: <defaults>
</compile_context>

<pallas_src>
from functools import partial

import jax
import jax.numpy as jnp
from jax.experimental import pallas as pl
from jax.experimental.pallas import tpu as pltpu

IN_FEATURES = 200
N_OUT = 10            # logical out_features of fc2
N_PAD = 128           # lane-dense padded output width
DEFAULT_TM = 512      # multiple of 256 (v6e/v7x MXU), 85%+ of HBM roofline
_GRIDLESS_VMEM_BUDGET = 10 * 1024 * 1024   # conservative (v5e 16 MiB default)


def _linear_kernel(x_ref, w_ref, b_ref, o_ref):
    # x_ref: (tm, 200)  w_ref: (200, 128)  b_ref: (1, 128)  o_ref: (tm, 128)
    acc = jnp.dot(x_ref[...], w_ref[...], preferred_element_type=jnp.float32)
    o_ref[...] = (acc + b_ref[...]).astype(o_ref.dtype)


def prepare_params(weight, bias, dtype=None):
    """One-time parameter prep: transpose + zero-pad to lane-dense layout.

    weight: (10, 200) PyTorch layout;  bias: (10,)
    Returns w_pad (200, 128), b_pad (1, 128). Pass dtype=jnp.bfloat16 for the
    reduced-precision path (accumulation stays f32 inside the kernel).
    """
    if dtype is not None:
        weight = weight.astype(dtype)
        bias = bias.astype(dtype)
    k = weight.shape[1]
    w_pad = jnp.zeros((k, N_PAD), weight.dtype).at[:, :N_OUT].set(weight.T)
    b_pad = jnp.zeros((1, N_PAD), bias.dtype).at[:, :N_OUT].set(bias)
    return w_pad, b_pad


def _cost(B, K, x_itemsize, w_itemsize):
    return pl.CostEstimate(
        flops=2 * B * K * N_PAD,
        transcendentals=0,
        bytes_accessed=B * (K + N_PAD) * x_itemsize + (K + 1) * N_PAD * w_itemsize,
    )


@jax.jit
def part2_forward_padded(x, w_pad, b_pad):
    """Small-batch path: single gridless invocation, everything VMEM-resident.

    Returns the lane-dense (B, 128) result; columns [10:128] are zero.
    """
    B, K = x.shape
    ws = B * (K + N_PAD) * x.dtype.itemsize + (K + 1) * N_PAD * w_pad.dtype.itemsize
    vmem_limit = int(min(max(2 * ws, 8 * 1024 * 1024), 32 * 1024 * 1024))
    return pl.pallas_call(
        _linear_kernel,
        out_shape=jax.ShapeDtypeStruct((B, N_PAD), x.dtype),
        in_specs=[
            pl.BlockSpec(memory_space=pltpu.MemorySpace.VMEM),
            pl.BlockSpec(memory_space=pltpu.MemorySpace.VMEM),
            pl.BlockSpec(memory_space=pltpu.MemorySpace.VMEM),
        ],
        out_specs=pl.BlockSpec(memory_space=pltpu.MemorySpace.VMEM),
        compiler_params=pltpu.CompilerParams(vmem_limit_bytes=vmem_limit),
        cost_estimate=_cost(B, K, x.dtype.itemsize, w_pad.dtype.itemsize),
    )(x, w_pad, b_pad)


@partial(jax.jit, static_argnames=("tm",))
def part2_forward_tiled_padded(x, w_pad, b_pad, tm=DEFAULT_TM):
    """Large-batch path: tile over batch (tm=512 default); weights/bias stay
    VMEM-resident across the grid; batch axis "parallel" so megacore / v7x
    cores split the tiles. Ragged B is handled by Pallas' partial last block
    (no jnp.pad copy); out-of-bounds rows are never written back.

    Returns the lane-dense (B, 128) result; columns [10:128] are zero.
    """
    B, K = x.shape
    n_tiles = pl.cdiv(B, tm)
    return pl.pallas_call(
        _linear_kernel,
        out_shape=jax.ShapeDtypeStruct((B, N_PAD), x.dtype),
        grid=(n_tiles,),
        in_specs=[
            pl.BlockSpec((tm, K), lambda i: (i, 0)),
            pl.BlockSpec((K, N_PAD), lambda i: (0, 0)),
            pl.BlockSpec((1, N_PAD), lambda i: (0, 0)),
        ],
        out_specs=pl.BlockSpec((tm, N_PAD), lambda i: (i, 0)),
        compiler_params=pltpu.CompilerParams(
            dimension_semantics=("parallel",),
        ),
        cost_estimate=_cost(B, K, x.dtype.itemsize, w_pad.dtype.itemsize),
    )(x, w_pad, b_pad)


def part2_forward(x, w_pad, b_pad, tm=DEFAULT_TM):
    """Dispatching wrapper reproducing the nn.Linear(200, 10) forward.

    Returns the logical (B, 10) output; the narrow slice is applied here, at
    the consumer, outside the jitted kernels so it can fuse downstream.
    """
    B, K = x.shape
    itemsize = jnp.dtype(x.dtype).itemsize
    gridless_ws = B * (K + N_PAD) * itemsize + (K + 1) * N_PAD * jnp.dtype(w_pad.dtype).itemsize
    if B >= 2 * tm or gridless_ws > _GRIDLESS_VMEM_BUDGET:
        y_pad = part2_forward_tiled_padded(x, w_pad, b_pad, tm=tm)
    else:
        # TODO(synk): for very small B (<=64) letting XLA fuse the GEMM with
        # neighbors usually beats a standalone pallas_call; kept in Pallas here.
        y_pad = part2_forward_padded(x, w_pad, b_pad)
    return y_pad[:, :N_OUT]


if __name__ == "__main__":
    key = jax.random.PRNGKey(0)
    k_x, k_w, k_b, k_x2 = jax.random.split(key, 4)

    # Deterministic "nn.Linear"-style init: U(-bound, bound), bound = 1/sqrt(fan_in)
    bound = 1.0 / jnp.sqrt(jnp.float32(IN_FEATURES))
    weight = jax.random.uniform(
        k_w, (N_OUT, IN_FEATURES), dtype=jnp.float32, minval=-bound, maxval=bound)
    bias = jax.random.uniform(
        k_b, (N_OUT,), dtype=jnp.float32, minval=-bound, maxval=bound)

    # One-time parameter prep (outside the forward path).
    w_pad, b_pad = prepare_params(weight, bias)

    # --- small-batch gridless path ---
    batch_small = 8
    x_small = jax.random.normal(k_x, (batch_small, IN_FEATURES), dtype=jnp.float32)
    y_small = part2_forward(x_small, w_pad, b_pad)
    jax.block_until_ready(y_small)
    ref_small = x_small @ weight.T + bias
    assert y_small.shape == (batch_small, N_OUT)
    assert jnp.allclose(y_small, ref_small, atol=1e-5, rtol=1e-5)

    # --- tiled path with a ragged batch (partial last tile, no jnp.pad) ---
    batch_ragged = 300
    tm_test = 256   # keep the test small; production default is 512
    x_ragged = jax.random.normal(k_x2, (batch_ragged, IN_FEATURES), dtype=jnp.float32)
    y_ragged = part2_forward_tiled_padded(x_ragged, w_pad, b_pad, tm=tm_test)[:, :N_OUT]
    jax.block_until_ready(y_ragged)
    ref_ragged = x_ragged @ weight.T + bias
    assert y_ragged.shape == (batch_ragged, N_OUT)
    assert jnp.allclose(y_ragged, ref_ragged, atol=1e-5, rtol=1e-5)

    # --- optional bf16 activation/weight path (f32 accumulation in-kernel) ---
    w_pad_bf16, b_pad_bf16 = prepare_params(weight, bias, dtype=jnp.bfloat16)
    y_bf16 = part2_forward(x_small.astype(jnp.bfloat16), w_pad_bf16, b_pad_bf16)
    jax.block_until_ready(y_bf16)
    assert y_bf16.shape == (batch_small, N_OUT)
    assert jnp.allclose(y_bf16.astype(jnp.float32), ref_small, atol=0.15, rtol=0.15)

    print("KERNEL_OK")
</pallas_src>

<mosaic_0001>
module attributes {stable_mosaic.version = 11 : i64} {
  func.func @_linear_kernel(%arg0: memref<8x200xf32, #tpu.memory_space<vmem>>, %arg1: memref<200x128xf32, #tpu.memory_space<vmem>>, %arg2: memref<1x128xf32, #tpu.memory_space<vmem>>, %arg3: memref<8x128xf32, #tpu.memory_space<vmem>>) attributes {dimension_semantics = [], scalar_prefetch = 0 : i64, scratch_operands = 0 : i64, tpu.core_type = #tpu.core_type<tc>} {
    %c0 = arith.constant 0 : index
    %c0_0 = arith.constant 0 : index
    %0 = vector.load %arg0[%c0, %c0_0] : memref<8x200xf32, #tpu.memory_space<vmem>>, vector<8x200xf32>
    %c0_1 = arith.constant 0 : index
    %c0_2 = arith.constant 0 : index
    %1 = vector.load %arg1[%c0_1, %c0_2] : memref<200x128xf32, #tpu.memory_space<vmem>>, vector<200x128xf32>
    %cst = arith.constant dense<0.000000e+00> : vector<8x128xf32>
    %2 = tpu.matmul %0, %1, %cst {dimension_numbers = #tpu.dot_dimension_numbers<[1], [0], [0], [1], [0, 0, 1, 1], [], []>} : vector<8x200xf32>, vector<200x128xf32>, vector<8x128xf32> -> vector<8x128xf32>
    %c0_3 = arith.constant 0 : index
    %c0_4 = arith.constant 0 : index
    %3 = vector.load %arg2[%c0_3, %c0_4] : memref<1x128xf32, #tpu.memory_space<vmem>>, vector<1x128xf32>
    %4 = vector.broadcast %3 : vector<1x128xf32> to vector<8x128xf32>
    %5 = arith.addf %2, %4 : vector<8x128xf32>
    %c0_5 = arith.constant 0 : index
    %c0_6 = arith.constant 0 : index
    %6 = vector.load %arg3[%c0_5, %c0_6] : memref<8x128xf32, #tpu.memory_space<vmem>>, vector<8x128xf32>
    tpu.vector_store %arg3[%c0_5, %c0_6], %5 {strides = array<i32>} : memref<8x128xf32, #tpu.memory_space<vmem>>, vector<8x128xf32>,
    return
  }
}

</mosaic_0001>

<bundles_post_ra>
// kernel: part2_forward_padded.1
= control target key start
LH: loop header
LB: loop body
LE: loop exit
PB: predicated region body
PF: predicated region fallthrough
CT: control target
= control target key end

     0   :  { %8 = vsyncpa [#allocation3], 0  ;;  %s261_s0 = inlined_call_operand.hbm [shape: f32[8,200], index: 0, kind: input, shape index: {}]   ;;  %s262_s1 = inlined_call_operand.hbm [shape: f32[200,128], index: 1, kind: input, shape index: {}]   ;;  %s263_s2 = inlined_call_operand.vmem [shape: f32[1,128], index: 2, kind: input, shape index: {}]   ;;  %s264_s3 = inlined_call_operand.hbm [shape: f32[8,128], index: 3, kind: output, shape index: {}]  }
   0x1   :  { %9 = vsyncpa [#allocation6], 0 }
   0x2   :  { %10 = vsyncpa [#allocation4], 0  ;;  %s16_s14 = sshll.u32 %s261_s0, 4  ;;  %s224_s15 = smov [#allocation2]   ;;  %s17_s14 = int_to_ptr.hbm [resolvable:$true] %s16_s14 }
   0x3   :  { %s18_s16 = sshll.u32 %s224_s15, 4  ;;  %s26_s19 = sshll.u32 %s262_s1, 4  ;;  %s19_s16 = int_to_ptr.vmem [resolvable:$true] %s18_s16  ;;  %s27_s19 = int_to_ptr.hbm [resolvable:$true] %s26_s19 }
   0x4   :  { %21 = dma.hbm_to_vmem [thread:$0]  %s17_s14, 256, %s19_s16, [#allocation3]  }
   0x5   :  { %s225_s20 = smov [#allocation5]   ;;  %s226_s22 = smov 128  }
   0x6   :  { %s28_s21 = sshll.u32 %s225_s20, 4  ;;  %s227_s23 = smov 8   ;;  %s29_s21 = int_to_ptr.vmem [resolvable:$true] %s28_s21 }
   0x7   :  { %34 = dma.hbm_to_vmem [thread:$0]  %s27_s19, 3200, %s29_s21, [#allocation6], %s226_s22, %s226_s22, %s227_s23  }
   0x8   :  { %218 = dma.done.wait [#allocation3], 256  }
   0x9   :  { %219 = vsyncadd [#allocation3], 4294967040 }
   0xa   :  { %220 = dma.done.wait [#allocation6], 3200  }
   0xb   :  { %221 = vsyncadd [#allocation6], 4294964096  ;;  %v62_v0 = vld [vmem:[#allocation5 + $0x78] sm:$0xff]  ;;  %v61_v1 = vld [vmem:[#allocation5 + $0x70] sm:$0xff]  ;;  %vm76_vm0 = vcmask 588800   ;;  %s228_s24 = smov [#allocation7]  }
   0xc   :  { %80 = vmatpush.msra.mxu0 %v62_v0  ;;  %v60_v2 = vld [vmem:[#allocation5 + $0x68] sm:$0xff]  ;;  %v71_v3 = vld [vmem:[#allocation5 + $0xc0] sm:$0xff]  ;;  %v70_v4 = vld [vmem:[#allocation5 + $0xb8] sm:$0xff]  ;;  %s126_s25 = sshll.u32 %s228_s24, 4  ;;  %s128_s28 = sshll.u32 %s264_s3, 4  ;;  %s127_s25 = int_to_ptr.vmem [resolvable:$true] %s126_s25  ;;  %s129_s28 = int_to_ptr.hbm [resolvable:$true] %s128_s28 }
   0xd   :  { %v59_v5 = vld [vmem:[#allocation5 + $0x60] sm:$0xff]  ;;  %107 = vmatpush.msra.mxu1 %v71_v3  ;;  %v69_v6 = vld [vmem:[#allocation5 + $0xb0] sm:$0xff]  ;;  %v58_v7 = vld [vmem:[#allocation5 + $0x58] sm:$0xff] }
   0xe   :  { %81 = vmatpush.msra.mxu0 %v61_v1  ;;  %v68_v8 = vld [vmem:[#allocation5 + $0xa8] sm:$0xff]  ;;  %v57_v9 = vld [vmem:[#allocation5 + $0x50] sm:$0xff]  ;;  %v67_v10 = vld [vmem:[#allocation5 + $0xa0] sm:$0xff] }
   0xf   :  { %108 = vmatpush.msra.mxu1 %v70_v4  ;;  %v56_v11 = vld [vmem:[#allocation5 + $0x48] sm:$0xff]  ;;  %v66_v12 = vld [vmem:[#allocation5 + $0x98] sm:$0xff]  ;;  %v55_v13 = vld [vmem:[#allocation5 + $0x40] sm:$0xff] }
  0x10   :  { %82 = vmatpush.msra.mxu0 %v60_v2  ;;  %v65_v14 = vld [vmem:[#allocation5 + $0x90] sm:$0xff]  ;;  %v54_v15 = vld [vmem:[#allocation5 + $0x38] sm:$0xff]  ;;  %v64_v16 = vld [vmem:[#allocation5 + $0x88] sm:$0xff] }
  0x11   :  { %109 = vmatpush.msra.mxu1 %v69_v6  ;;  %v53_v17 = vld [vmem:[#allocation5 + $0x30] sm:$0xff]  ;;  %v63_v18 = vld [vmem:[#allocation5 + $0x80] sm:$0xff]  ;;  %v52_v19 = vld [vmem:[#allocation5 + $0x28] sm:$0xff] }
  0x12   :  { %83 = vmatpush.msra.mxu0 %v59_v5  ;;  %v46_v20 = vld [vmem:[#allocation2 + $0x8] sm:$0xff]  ;;  %v51_v21 = vld [vmem:[#allocation5 + $0x20] sm:$0xff]  ;;  %v49_v23 = vld [vmem:[#allocation5 + $0x10] sm:$0xff] }
  0x13   :  { %110 = vmatpush.msra.mxu1 %v68_v8  ;;  %v50_v22 = vld [vmem:[#allocation5 + $0x18] sm:$0xff]  ;;  %v48_v24 = vld [vmem:[#allocation5 + $0x8] sm:$0xff]  ;;  %v47_v25 = vld [vmem:[#allocation5] sm:$0xff] }
  0x14   :  { %84 = vmatpush.msra.mxu0 %v58_v7  ;;  %v45_v26 = vld [vmem:[#allocation2] sm:$0xff] }
  0x15   :  { %111 = vmatpush.msra.mxu1 %v67_v10  ;;  %v145_v27 = vld [vmem:[%s263_s2] ss:$0 sm:$0xff] }
  0x16   :  { %85 = vmatpush.msra.mxu0 %v57_v9 }
  0x17   :  { %112 = vmatpush.msra.mxu1 %v66_v12 }
  0x18   :  { %86 = vmatpush.msra.mxu0 %v56_v11 }
  0x19   :  { %113 = vmatpush.msra.mxu1 %v65_v14 }
  0x1a   :  { %87 = vmatpush.msra.mxu0 %v55_v13 }
  0x1b   :  { %114 = vmatpush.msra.mxu1 %v64_v16 }
  0x1c   :  { %88 = vmatpush.msra.mxu0 %v54_v15 }
  0x1d   :  { %115 = vmatpush.msra.mxu1 %v63_v18 }
  0x1e   :  { %89 = vmatpush.msra.mxu0 %v53_v17  ;;  %139 = vmatmul.msk.f32.vlgmr.msra.gmra.mxu1 %vm76_vm0, %v46_v20 }
  0x20   :  { %90 = vmatpush.msra.mxu0 %v52_v19 }
  0x22   :  { %91 = vmatpush.msra.mxu0 %v51_v21 }
  0x24   :  { %92 = vmatpush.msra.mxu0 %v50_v22 }
  0x26   :  { %93 = vmatpush.msra.mxu0 %v49_v23 }
  0x28   :  { %94 = vmatpush.msra.mxu0 %v48_v24 }
  0x2a   :  { %95 = vmatpush.msra.mxu0 %v47_v25 }
  0x2b   :  { %96 = vmatmul.f32.vlgmr.msra.gmra.mxu0 %v45_v26 }
  0x9b   :  { %v117_v29 = vpop.f32.mrf.mxu1 }
  0xa8   :  { %v97_v28 = vpop.f32.mrf.mxu0 }
  0xa9   :  { %v98_v30 = vadd.f32 %v145_v27, %v97_v28 }
  0xab   :  { %v118_v31 = vadd.f32 %v117_v29, %v98_v30 }
  0xad   :  { %120 = vst [vmem:[#allocation7] sm:$0xff] %v118_v31 }
  0xae   :  { %131 = dma.vmem_to_hbm [thread:$0]  %s127_s25, 128, %s129_s28, [#allocation4]  }
  0xaf   :  { %222 = dma.done.wait [#allocation4], 128  }
  0xb0   :  { %223 = vsyncadd [#allocation4], 4294967168 }
  0xb1   :  { %136 = vsyncpa [#allocation3], 1 }
  0xb2   :  { %137 = vsyncpa [#allocation6], 1 }
  0xb3   :  { %138 = vsyncpa [#allocation4], 1 }

</bundles_post_ra>
